<compile_context>
chip_gen: v7x
topology: tpu7x:2x2x1
jax: 0.10.0
libtpu: 0.0.40
codegen_flags: <defaults>
</compile_context>

<pallas_src>
import jax
import jax.numpy as jnp
from jax.experimental import pallas as pl
from jax.experimental.pallas import tpu as pltpu  # noqa: F401  (TPU backend)

# ----------------------------- configuration --------------------------------
B = 2            # batch
N = 8            # tokens / spatial positions per batch element
FEATURE_DIM = 128  # lane-dense channel dim
T = 16           # number of text features (classes)


# ------------------------------- kernel --------------------------------------
def feature_variance_kernel(x_ref, txt_ref, o_ref):
    """Fused similarity + population-variance kernel.

    x_ref:   (B*N, C)  flattened image/feature tokens
    txt_ref: (T, C)    text features
    o_ref:   (B*N, 1)  per-token variance over the T similarity scores
    """
    x = x_ref[...].astype(jnp.float32)        # (BN, C)
    txt = txt_ref[...].astype(jnp.float32)    # (T, C)

    # similarity = x @ txt.T  -> contract the shared feature dim on the MXU
    # (dot_general with rhs contracting dim = 1 avoids an explicit transpose).
    sim = jax.lax.dot_general(
        x, txt,
        dimension_numbers=(((1,), (1,)), ((), ())),
        preferred_element_type=jnp.float32,
    )                                         # (BN, T)

    # torch.var(..., dim=1, unbiased=False): population variance over T.
    mean = jnp.mean(sim, axis=-1, keepdims=True)          # (BN, 1)
    var = jnp.mean((sim - mean) ** 2, axis=-1, keepdims=True)  # (BN, 1)

    o_ref[...] = var.astype(o_ref.dtype)


# ------------------------------- wrapper --------------------------------------
def feature_variance(features, text_features):
    """Pallas implementation of FeatureVariance.forward.

    features:      (B, N, feature_dim)
    text_features: (T, feature_dim)
    returns:       (B, N) float32 variance map
    """
    Bb, Nn, C = features.shape
    Tt = text_features.shape[0]
    bn = Bb * Nn

    x = features.reshape(bn, C)  # flatten outside the kernel (layout plumbing)

    out = pl.pallas_call(
        feature_variance_kernel,
        out_shape=jax.ShapeDtypeStruct((bn, 1), jnp.float32),
        # grid=() : single invocation, everything in VMEM, no per-step overhead.
        in_specs=[
            pl.BlockSpec((bn, C), lambda: (0, 0)),
            pl.BlockSpec((Tt, C), lambda: (0, 0)),
        ],
        out_specs=pl.BlockSpec((bn, 1), lambda: (0, 0)),
    )(x, text_features)

    return out.reshape(Bb, Nn)


# --------------------------- pure-JAX reference -------------------------------
def _ref_feature_variance(features, text_features):
    Bb, Nn, C = features.shape
    x = features.reshape(-1, C)
    sim = x @ text_features.T
    mean = jnp.mean(sim, axis=1, keepdims=True)
    var = jnp.mean((sim - mean) ** 2, axis=1)   # unbiased=False
    return var.reshape(Bb, Nn)


# --------------------------------- main ---------------------------------------
if __name__ == "__main__":
    key = jax.random.PRNGKey(0)
    kf, kt = jax.random.split(key, 2)
    features = jax.random.normal(kf, (B, N, FEATURE_DIM), jnp.float32)
    text_features = jax.random.normal(kt, (T, FEATURE_DIM), jnp.float32)

    out = feature_variance(features, text_features)
    out = jax.block_until_ready(out)

    ref = jax.block_until_ready(_ref_feature_variance(features, text_features))
    assert out.shape == (B, N), f"bad shape {out.shape}"
    assert jnp.allclose(out, ref, atol=1e-4, rtol=1e-4), (
        f"max abs err {jnp.max(jnp.abs(out - ref))}")

    print("KERNEL_OK")
</pallas_src>

<mosaic_0001>
module attributes {stable_mosaic.version = 11 : i64} {
  func.func @feature_variance_kernel(%arg0: memref<16x128xf32, #tpu.memory_space<vmem>>, %arg1: memref<16x128xf32, #tpu.memory_space<vmem>>, %arg2: memref<16x1xf32, #tpu.memory_space<vmem>>) attributes {dimension_semantics = [], scalar_prefetch = 0 : i64, scratch_operands = 0 : i64, tpu.core_type = #tpu.core_type<tc>} {
    %c0 = arith.constant 0 : index
    %c0_0 = arith.constant 0 : index
    %0 = vector.load %arg0[%c0, %c0_0] : memref<16x128xf32, #tpu.memory_space<vmem>>, vector<16x128xf32>
    %c0_1 = arith.constant 0 : index
    %c0_2 = arith.constant 0 : index
    %1 = vector.load %arg1[%c0_1, %c0_2] : memref<16x128xf32, #tpu.memory_space<vmem>>, vector<16x128xf32>
    %cst = arith.constant dense<0.000000e+00> : vector<16x16xf32>
    %2 = tpu.matmul %0, %1, %cst {dimension_numbers = #tpu.dot_dimension_numbers<[1], [1], [0], [0], [0, 0, 1, 0], [], []>} : vector<16x128xf32>, vector<16x128xf32>, vector<16x16xf32> -> vector<16x16xf32>
    %cst_3 = arith.constant dense<0.000000e+00> : vector<16xf32>
    %3 = vector.multi_reduction <add>, %2, %cst_3 [1] : vector<16x16xf32> to vector<16xf32>
    %4 = vector.shape_cast %3 : vector<16xf32> to vector<16x1xf32>
    %cst_4 = arith.constant 1.600000e+01 : f32
    %5 = vector.broadcast %cst_4 : f32 to vector<16x1xf32>
    %6 = arith.divf %4, %5 : vector<16x1xf32>
    %7 = vector.broadcast %6 : vector<16x1xf32> to vector<16x16xf32>
    %8 = arith.subf %2, %7 : vector<16x16xf32>
    %9 = arith.mulf %8, %8 : vector<16x16xf32>
    %cst_5 = arith.constant dense<0.000000e+00> : vector<16xf32>
    %10 = vector.multi_reduction <add>, %9, %cst_5 [1] : vector<16x16xf32> to vector<16xf32>
    %11 = vector.shape_cast %10 : vector<16xf32> to vector<16x1xf32>
    %cst_6 = arith.constant 1.600000e+01 : f32
    %12 = vector.broadcast %cst_6 : f32 to vector<16x1xf32>
    %13 = arith.divf %11, %12 : vector<16x1xf32>
    %c0_7 = arith.constant 0 : index
    %c0_8 = arith.constant 0 : index
    %14 = vector.load %arg2[%c0_7, %c0_8] : memref<16x1xf32, #tpu.memory_space<vmem>>, vector<16x1xf32>
    tpu.vector_store %arg2[%c0_7, %c0_8], %13 {strides = array<i32>} : memref<16x1xf32, #tpu.memory_space<vmem>>, vector<16x1xf32>,
    return
  }
}

</mosaic_0001>

<bundles_post_ra>
// kernel: tpu_custom_call.1
= control target key start
LH: loop header
LB: loop body
LE: loop exit
PB: predicated region body
PF: predicated region fallthrough
CT: control target
= control target key end

     0   :  { %7 = vsyncpa [#allocation3], 0  ;;  %s269_s0 = inlined_call_operand.hbm [shape: f32[16,128], index: 0, kind: input, shape index: {}]   ;;  %s270_s1 = inlined_call_operand.hbm [shape: f32[16,128], index: 1, kind: input, shape index: {}]   ;;  %s271_s2 = inlined_call_operand.vmem [shape: f32[16,1], index: 2, kind: output, shape index: {}]  }
   0x1   :  { %8 = vsyncpa [#allocation5], 0  ;;  %s216_s9 = smov [#allocation2]   ;;  %s168_s13 = scalar_lea.hbm %s269_s0, 256 }
   0x2   :  { %s14_s10 = sshll.u32 %s216_s9, 4  ;;  %p169_p0 = scmp.ne.s32.totalorder %s269_s0, %s168_s13  ;;  %s15_s10 = int_to_ptr.vmem [resolvable:$true] %s14_s10 }
   0x3   :  { %p172_p1 = scmp.lt.u32.totalorder %s168_s13, %s269_s0 }
   0x5   :  { %p174_p2 = pnand %p172_p1, %p169_p0 }
   0x7   :  { %177 = shalt.err (!%p174_p2)
}
   0x8   :  { %s178_s18 = scalar_lea.vmem %s15_s10, 256  ;;  %p183_p4 = scmp.lt.s32.totalorder %s15_s10, %s15_s10 }
   0x9   :  { %p179_p3 = scmp.ne.s32.totalorder %s15_s10, %s178_s18  ;;  %p184_p5 = scmp.lt.s32.totalorder %s178_s18, %s178_s18 }
   0xb   :  { %p185_p6 = por %p184_p5, %p183_p4 }
   0xd   :  { %p186_p7 = pnand %p185_p6, %p179_p3 }
   0xf   :  { %189 = shalt.err (!%p186_p7)
}
  0x10   :  { %s217_s19 = smov 128   ;;  %s218_s20 = smov 8  }
  0x11   :  { %20 = dma.hbm_to_vmem [thread:$0]  %s269_s0, 256, %s15_s10, [#allocation3], %s217_s19, %s217_s19, %s218_s20  }
  0x12   :  { %s219_s23 = smov [#allocation4]   ;;  %s190_s27 = scalar_lea.hbm %s270_s1, 256 }
  0x13   :  { %s26_s24 = sshll.u32 %s219_s23, 4  ;;  %p191_p8 = scmp.ne.s32.totalorder %s270_s1, %s190_s27  ;;  %s27_s24 = int_to_ptr.vmem [resolvable:$true] %s26_s24 }
  0x14   :  { %p194_p9 = scmp.lt.u32.totalorder %s190_s27, %s270_s1 }
  0x16   :  { %p196_p10 = pnand %p194_p9, %p191_p8 }
  0x18   :  { %199 = shalt.err (!%p196_p10)
}
  0x19   :  { %s200_s4 = scalar_lea.vmem %s27_s24, 256  ;;  %p205_p12 = scmp.lt.s32.totalorder %s27_s24, %s27_s24 }
  0x1a   :  { %p201_p11 = scmp.ne.s32.totalorder %s27_s24, %s200_s4  ;;  %p206_p13 = scmp.lt.s32.totalorder %s200_s4, %s200_s4 }
  0x1c   :  { %p207_p0 = por %p206_p13, %p205_p12 }
  0x1e   :  { %p208_p1 = pnand %p207_p0, %p201_p11 }
  0x20   :  { %211 = shalt.err (!%p208_p1)
}
  0x21   :  { %32 = dma.hbm_to_vmem [thread:$0]  %s270_s1, 256, %s27_s24, [#allocation5], %s217_s19, %s217_s19, %s218_s20  }
  0x22   :  { %212 = dma.done.wait [#allocation3], 256  }
  0x23   :  { %213 = vsyncadd [#allocation3], 4294967040 }
  0x24   :  { %214 = dma.done.wait [#allocation5], 256  }
  0x25   :  { %215 = vsyncadd [#allocation5], 4294967040  ;;  %v41_v0 = vld [vmem:[#allocation4] sm:$0xff]  ;;  %v42_v1 = vld [vmem:[#allocation4 + $0x8] sm:$0xff]  ;;  %vm118_vm0 = vcmask 130048   ;;  %vm140_vm1 = vcmask 7168  }
  0x26   :  { %v39_v2 = vld [vmem:[#allocation2] sm:$0xff]  ;;  %v160_v3 = vpack.c.bf16 %v42_v1, %v41_v0  ;;  %v40_v4 = vld [vmem:[#allocation2 + $0x8] sm:$0xff] }
  0x27   :  { %157 = vmatprep.mubr.f32.mxu0 %v39_v2 }
  0x28   :  { %161 = vmatprep.subr.bf16.mxu0 %v160_v3 }
  0x29   :  { %163 = vmatpush3.bf16.xpose.msra.mxu0 %v160_v3 }
  0x30   :  { %158 = vmatmul.mubr.f32.vlgmr.msra.gmra.mrb[0].mxu0 %v40_v4 }
 0x103   :  { %v159_v5 = vpop.f32.mrb[0].mxu0 }
 0x104   :  { %v109_v6 = vpop.f32.mrb[1].mxu0  ;;  %v122_v8 = vsel %vm118_vm0, %v159_v5, 0.0 }
 0x105   :  { %v119_v7 = vsel %vm118_vm0, %v109_v6, 0.0 }
 0x106   :  { %120 = vadd.xlane.f32.xlu0 %v119_v7 }
 0x10a   :  { %123 = vadd.xlane.f32.xlu0 %v122_v8 }
 0x193   :  { %v121_v9 = vpop.xlane.xlu0 %120 }
 0x194   :  { %v126_v10 = vmul.f32 0.0625, %v121_v9 }
 0x196   :  { %v128_v11 = vsub.f32 %v109_v6, %v126_v10 }
 0x197   :  { %v124_v12 = vpop.xlane.xlu0 %123 }
 0x198   :  { %v127_v13 = vmul.f32 0.0625, %v124_v12  ;;  %v130_v14 = vmul.f32 %v128_v11, %v128_v11 }
 0x19a   :  { %v129_v15 = vsub.f32 %v159_v5, %v127_v13  ;;  %v132_v16 = vsel %vm118_vm0, %v130_v14, 0.0 }
 0x19b   :  { %133 = vadd.xlane.f32.xlu1 %v132_v16 }
 0x19c   :  { %v131_v17 = vmul.f32 %v129_v15, %v129_v15 }
 0x19e   :  { %v135_v18 = vsel %vm118_vm0, %v131_v17, 0.0 }
 0x19f   :  { %136 = vadd.xlane.f32.xlu1 %v135_v18 }
 0x228   :  { %v134_v19 = vpop.xlane.xlu1 %133 }
 0x229   :  { %v138_v20 = vmul.f32 0.0625, %v134_v19 }
 0x22b   :  { %141 = vst.msk [vmem:[%s271_s2] sm:$0xff] %vm140_vm1, %v138_v20 }
 0x22c   :  { %v137_v21 = vpop.xlane.xlu1 %136 }
 0x22d   :  { %v139_v22 = vmul.f32 0.0625, %v137_v21 }
 0x22f   :  { %142 = vst.msk [vmem:[%s271_s2 + $0x8] sm:$0xff] %vm140_vm1, %v139_v22 }
 0x230   :  { %147 = vsyncpa [#allocation3], 1 }
 0x231   :  { %148 = vsyncpa [#allocation5], 1 }

</bundles_post_ra>
